<compile_context>
chip_gen: v7x
topology: tpu7x:2x2x1
jax: 0.10.0
libtpu: 0.0.40
codegen_flags: <defaults>
</compile_context>

<pallas_src>
import functools

import jax
import jax.numpy as jnp
from jax import lax
from jax.experimental import pallas as pl
from jax.experimental.pallas import tpu as pltpu

HIDDEN = 16  # MLP(2, [16], 1)


def _round_up(x, m):
    return (x + m - 1) // m * m


def _mlp_logits(x_ref, w1_ref, b1_ref, w2_ref, b2_ref):
    """logits[s, c] = w2 . relu(w1 @ x[:, s, c] + b1) + b2.

    Pure VPU scalar*vector FMAs — a K=2 / out=1 matmul would waste >98% of the MXU.
    x_ref : (2, 8, T) VMEM block;  weights are SMEM scalars.
    """
    x0 = x_ref[0, :, :]            # (8, T)
    x1 = x_ref[1, :, :]            # (8, T)
    hidden = b1_ref.shape[0]
    acc = jnp.zeros_like(x0)
    for k in range(hidden):        # static unroll, hidden == 16
        h_k = jnp.maximum(w1_ref[k] * x0 + w1_ref[hidden + k] * x1 + b1_ref[k], 0.0)
        acc = acc + w2_ref[k] * h_k
    return acc + b2_ref[0]         # (8, T)


def _mask_invalid(logits, lane_off, c_pad, n_valid):
    # Folded position (s, c) corresponds to original column s*c_pad + c.
    s = lax.broadcasted_iota(jnp.int32, logits.shape, 0)
    c = lax.broadcasted_iota(jnp.int32, logits.shape, 1) + lane_off
    return jnp.where(s * c_pad + c < n_valid, logits, -jnp.inf)


def _max2(x):   # (8, T) -> (1, 1), lane reduce then sublane reduce
    return jnp.max(jnp.max(x, axis=1, keepdims=True), axis=0, keepdims=True)


def _sum2(x):   # (8, T) -> (1, 1)
    return jnp.sum(jnp.sum(x, axis=1, keepdims=True), axis=0, keepdims=True)


# ---------------------------------------------------------------------------
# Small/medium N: one full-extent block, direct softmax, single normalized store.
# ---------------------------------------------------------------------------
def _single_block_kernel(x_ref, w1_ref, b1_ref, w2_ref, b2_ref, o_ref, *, n_valid):
    c = o_ref.shape[1]
    logits = _mlp_logits(x_ref, w1_ref, b1_ref, w2_ref, b2_ref)      # (8, c)
    if n_valid < 8 * c:                                               # static check
        logits = _mask_invalid(logits, 0, c, n_valid)
    m = _max2(logits)
    p = jnp.exp(logits - m)
    o_ref[...] = p * pl.reciprocal(_sum2(p), approx=False)           # exact (1e-5 parity)


# ---------------------------------------------------------------------------
# Large N, pass 1: per-tile p = exp(logits - m_tile) plus per-tile (m_tile, l_tile).
# Fully "parallel" grid — no cross-tile state, both TCs usable on v7x.
# ---------------------------------------------------------------------------
def _tiled_partial_kernel(x_ref, w1_ref, b1_ref, w2_ref, b2_ref,
                          p_ref, m_ref, l_ref, *, n_valid, c_pad):
    i = pl.program_id(0)
    tile = p_ref.shape[1]
    logits = _mlp_logits(x_ref, w1_ref, b1_ref, w2_ref, b2_ref)      # (8, tile)
    if n_valid < 8 * c_pad:                                           # static check
        logits = _mask_invalid(logits, i * tile, c_pad, n_valid)
    m_t = _max2(logits)                                               # finite: sublane 0 is always valid
    p = jnp.exp(logits - m_t)
    l_t = _sum2(p)
    p_ref[...] = p
    m_ref[...] = jnp.broadcast_to(m_t, m_ref.shape)                   # (8,128) stats slab
    l_ref[...] = jnp.broadcast_to(l_t, l_ref.shape)


# ---------------------------------------------------------------------------
# Large N, pass 2: out_tile = p_tile * exp(m_tile - m_final) / l_final
# (per-tile scale is precomputed in the wrapper -> one broadcast multiply here).
# ---------------------------------------------------------------------------
def _rescale_kernel(scales_ref, p_ref, o_ref):
    o_ref[...] = p_ref[...] * scales_ref[pl.program_id(0)]


def msg_weight_net_feature_major(x_fm, w1, b1, w2, b2, *,
                                 tile_lanes=16384, single_block_max=131072):
    """MsgWeightNet forward on feature-major input.

    x_fm : (2, N) float32 — preferred layout (N on lanes); produce this upstream
           to avoid an extra full-HBM-round-trip transpose.
    w1 : (2, 16), b1 : (1, 16), w2 : (16, 1), b2 : (1, 1)  (JAX (in, out) convention)
    Returns (1, N) == softmax(MLP(x), dim=0).transpose(1, 0).
    """
    assert x_fm.ndim == 2 and x_fm.shape[0] == 2
    n = x_fm.shape[1]
    x_fm = jnp.asarray(x_fm, jnp.float32)
    w1f = jnp.asarray(w1, jnp.float32).reshape(-1)   # (2H,), w1f[j*H + k] == w1[j, k]
    b1f = jnp.asarray(b1, jnp.float32).reshape(-1)   # (H,)
    w2f = jnp.asarray(w2, jnp.float32).reshape(-1)   # (H,)
    b2f = jnp.asarray(b2, jnp.float32).reshape(-1)   # (1,)

    smem = pl.BlockSpec(memory_space=pltpu.MemorySpace.SMEM)

    if n <= single_block_max:
        # Common case: one full-extent (2, 8, C) block; skip online-softmax machinery.
        n_pad = _round_up(n, 8)
        c = n_pad // 8
        xp = x_fm if n_pad == n else jnp.pad(x_fm, ((0, 0), (0, n_pad - n)))
        x_folded = xp.reshape(2, 8, c)     # free row-major fold -> 8x sublane occupancy
        out = pl.pallas_call(
            functools.partial(_single_block_kernel, n_valid=n),
            out_shape=jax.ShapeDtypeStruct((8, c), jnp.float32),
            grid_spec=pltpu.PrefetchScalarGridSpec(
                num_scalar_prefetch=0,
                grid=(1,),
                in_specs=[pl.BlockSpec((2, 8, c), lambda i: (0, 0, 0)),
                          smem, smem, smem, smem],
                out_specs=pl.BlockSpec((8, c), lambda i: (0, 0)),
            ),
            compiler_params=pltpu.CompilerParams(
                dimension_semantics=("arbitrary",)),
        )(x_folded, w1f, b1f, w2f, b2f)
        return out.reshape(1, n_pad)[:, :n]

    # ---- Large-N path: two "parallel" passes + tiny O(num_tiles) merge. ----
    tile = tile_lanes                                  # multiple of 128
    n_pad = _round_up(n, 8 * tile)
    c_pad = n_pad // 8
    num_tiles = c_pad // tile
    xp = x_fm if n_pad == n else jnp.pad(x_fm, ((0, 0), (0, n_pad - n)))
    x_folded = xp.reshape(2, 8, c_pad)

    p, m_slab, l_slab = pl.pallas_call(
        functools.partial(_tiled_partial_kernel, n_valid=n, c_pad=c_pad),
        out_shape=(jax.ShapeDtypeStruct((8, c_pad), jnp.float32),
                   jax.ShapeDtypeStruct((8 * num_tiles, 128), jnp.float32),
                   jax.ShapeDtypeStruct((8 * num_tiles, 128), jnp.float32)),
        grid_spec=pltpu.PrefetchScalarGridSpec(
            num_scalar_prefetch=0,
            grid=(num_tiles,),
            in_specs=[pl.BlockSpec((2, 8, tile), lambda i: (0, 0, i)),
                      smem, smem, smem, smem],
            out_specs=(pl.BlockSpec((8, tile), lambda i: (0, i)),
                       pl.BlockSpec((8, 128), lambda i: (i, 0)),
                       pl.BlockSpec((8, 128), lambda i: (i, 0))),
        ),
        compiler_params=pltpu.CompilerParams(
            dimension_semantics=("parallel",)),
    )(x_folded, w1f, b1f, w2f, b2f)

    # Tiny merge over num_tiles scalars (standard flash-style softmax combine).
    m_tiles = m_slab[0::8, 0]                                   # (num_tiles,)
    l_tiles = l_slab[0::8, 0]
    m_fin = jnp.max(m_tiles)
    l_fin = jnp.sum(l_tiles * jnp.exp(m_tiles - m_fin))
    scales = (jnp.exp(m_tiles - m_fin) / l_fin).astype(jnp.float32)

    out = pl.pallas_call(
        _rescale_kernel,
        out_shape=jax.ShapeDtypeStruct((8, c_pad), jnp.float32),
        grid_spec=pltpu.PrefetchScalarGridSpec(
            num_scalar_prefetch=0,
            grid=(num_tiles,),
            in_specs=[smem, pl.BlockSpec((8, tile), lambda i: (0, i))],
            out_specs=pl.BlockSpec((8, tile), lambda i: (0, i)),
        ),
        compiler_params=pltpu.CompilerParams(
            dimension_semantics=("parallel",)),
    )(scales, p)
    return out.reshape(1, n_pad)[:, :n]


def msg_weight_net(x, w1, b1, w2, b2, **kw):
    """PyTorch-parity entry point: x is (N, 2) as in MsgWeightNet.forward.

    The transpose below is pure layout glue; prefer producing (2, N) upstream and
    calling msg_weight_net_feature_major so the relayout fuses into the producer.
    # TODO(synk): fuse this MLP+softmax into its consumer for the tiny-N regime.
    """
    return msg_weight_net_feature_major(
        jnp.asarray(x, jnp.float32).T, w1, b1, w2, b2, **kw)


def reference_forward(x, w1, b1, w2, b2):
    h = jnp.maximum(x @ w1 + b1, 0.0)
    logits = h @ w2 + b2
    return jax.nn.softmax(logits, axis=0).T


if __name__ == "__main__":
    key = jax.random.PRNGKey(0)
    k_x0, k_x1, k_x2, k_x3, k_w1, k_b1, k_w2, k_b2 = jax.random.split(key, 8)

    # Deterministic parameter init (shapes from MLP(2, [16], 1)).
    w1 = jax.random.normal(k_w1, (2, HIDDEN), dtype=jnp.float32) * (1.0 / jnp.sqrt(2.0))
    b1 = jax.random.normal(k_b1, (1, HIDDEN), dtype=jnp.float32) * 0.1
    w2 = jax.random.normal(k_w2, (HIDDEN, 1), dtype=jnp.float32) * 0.25
    b2 = jax.random.normal(k_b2, (1, 1), dtype=jnp.float32) * 0.1

    # 1) Tiny N, not a multiple of 8 -> single block + pad/mask path.
    N0 = 13
    x0 = jax.random.normal(k_x0, (N0, 2), dtype=jnp.float32)
    out0 = jax.block_until_ready(msg_weight_net(x0, w1, b1, w2, b2))
    ref0 = reference_forward(x0, w1, b1, w2, b2)
    assert out0.shape == (1, N0), out0.shape
    assert jnp.allclose(out0, ref0, atol=1e-5, rtol=1e-5)
    assert jnp.allclose(jnp.sum(out0), 1.0, atol=1e-5)

    # 2) Typical message count -> single full-extent block.
    N1 = 8
    x1 = jax.random.normal(k_x1, (N1, 2), dtype=jnp.float32)
    out1 = jax.block_until_ready(msg_weight_net(x1, w1, b1, w2, b2))
    ref1 = reference_forward(x1, w1, b1, w2, b2)
    assert out1.shape == (1, N1), out1.shape
    assert jnp.allclose(out1, ref1, atol=1e-5, rtol=1e-5)
    assert jnp.allclose(jnp.sum(out1), 1.0, atol=1e-5)

    # 3) Medium N -> still single block (no online softmax machinery).
    N2 = 1024
    x2 = jax.random.normal(k_x2, (N2, 2), dtype=jnp.float32)
    out2 = jax.block_until_ready(msg_weight_net(x2, w1, b1, w2, b2))
    ref2 = reference_forward(x2, w1, b1, w2, b2)
    assert out2.shape == (1, N2), out2.shape
    assert jnp.allclose(out2, ref2, atol=1e-5, rtol=1e-5)
    assert jnp.allclose(jnp.sum(out2), 1.0, atol=1e-4)

    # 4) Exercise the large-N two-pass "parallel" path (thresholds lowered so the
    #    test stays small): 10 tiles, ragged N -> pad + -inf masking.
    N3 = 20000
    x3 = jax.random.normal(k_x3, (N3, 2), dtype=jnp.float32)
    out3 = jax.block_until_ready(
        msg_weight_net(x3, w1, b1, w2, b2, tile_lanes=256, single_block_max=2048))
    ref3 = reference_forward(x3, w1, b1, w2, b2)
    assert out3.shape == (1, N3), out3.shape
    assert jnp.allclose(out3, ref3, atol=1e-6, rtol=1e-4)
    assert jnp.allclose(jnp.sum(out3), 1.0, atol=1e-4)

    print("KERNEL_OK")
</pallas_src>

<mosaic_0001>
module attributes {stable_mosaic.version = 11 : i64} {
  func.func @_single_block_kernel(%arg0: i32, %arg1: memref<2x8x2xf32, #tpu.memory_space<vmem>>, %arg2: memref<32xf32, #tpu.memory_space<smem>>, %arg3: memref<16xf32, #tpu.memory_space<smem>>, %arg4: memref<16xf32, #tpu.memory_space<smem>>, %arg5: memref<1xf32, #tpu.memory_space<smem>>, %arg6: memref<8x2xf32, #tpu.memory_space<vmem>>) attributes {dimension_semantics = [#tpu.dimension_semantics<arbitrary>], iteration_bounds = array<i64: 1>, scalar_prefetch = 0 : i64, scratch_operands = 0 : i64, tpu.core_type = #tpu.core_type<tc>, window_params = [{pipeline_mode = #tpu.pipeline_mode<synchronous>, transform_indices = @transform_0, window_bounds = array<i64: 2, 8, 2>}, {transform_indices = @transform_1, window_bounds = array<i64: 32>}, {transform_indices = @transform_2, window_bounds = array<i64: 16>}, {transform_indices = @transform_3, window_bounds = array<i64: 16>}, {transform_indices = @transform_4, window_bounds = array<i64: 1>}, {pipeline_mode = #tpu.pipeline_mode<synchronous>, transform_indices = @transform_5, window_bounds = array<i64: 8, 2>}]} {
    %c0 = arith.constant 0 : index
    %c0_0 = arith.constant 0 : index
    %c0_1 = arith.constant 0 : index
    %0 = vector.load %arg1[%c0, %c0_0, %c0_1] : memref<2x8x2xf32, #tpu.memory_space<vmem>>, vector<1x8x2xf32>
    %1 = vector.shape_cast %0 : vector<1x8x2xf32> to vector<8x2xf32>
    %c1 = arith.constant 1 : index
    %c0_2 = arith.constant 0 : index
    %c0_3 = arith.constant 0 : index
    %2 = vector.load %arg1[%c1, %c0_2, %c0_3] : memref<2x8x2xf32, #tpu.memory_space<vmem>>, vector<1x8x2xf32>
    %3 = vector.shape_cast %2 : vector<1x8x2xf32> to vector<8x2xf32>
    %cst = arith.constant 0.000000e+00 : f32
    %4 = vector.broadcast %cst : f32 to vector<8x2xf32>
    %c0_4 = arith.constant 0 : index
    %5 = memref.load %arg2[%c0_4] : memref<32xf32, #tpu.memory_space<smem>>
    %6 = vector.broadcast %5 : f32 to vector<8x2xf32>
    %7 = arith.mulf %6, %1 : vector<8x2xf32>
    %c16 = arith.constant 16 : index
    %8 = memref.load %arg2[%c16] : memref<32xf32, #tpu.memory_space<smem>>
    %9 = vector.broadcast %8 : f32 to vector<8x2xf32>
    %10 = arith.mulf %9, %3 : vector<8x2xf32>
    %11 = arith.addf %7, %10 : vector<8x2xf32>
    %c0_5 = arith.constant 0 : index
    %12 = memref.load %arg3[%c0_5] : memref<16xf32, #tpu.memory_space<smem>>
    %13 = vector.broadcast %12 : f32 to vector<8x2xf32>
    %14 = arith.addf %11, %13 : vector<8x2xf32>
    %cst_6 = arith.constant 0.000000e+00 : f32
    %15 = vector.broadcast %cst_6 : f32 to vector<8x2xf32>
    %16 = arith.maximumf %14, %15 : vector<8x2xf32>
    %c0_7 = arith.constant 0 : index
    %17 = memref.load %arg4[%c0_7] : memref<16xf32, #tpu.memory_space<smem>>
    %18 = vector.broadcast %17 : f32 to vector<8x2xf32>
    %19 = arith.mulf %18, %16 : vector<8x2xf32>
    %20 = arith.addf %4, %19 : vector<8x2xf32>
    %c1_8 = arith.constant 1 : index
    %21 = memref.load %arg2[%c1_8] : memref<32xf32, #tpu.memory_space<smem>>
    %22 = vector.broadcast %21 : f32 to vector<8x2xf32>
    %23 = arith.mulf %22, %1 : vector<8x2xf32>
    %c17 = arith.constant 17 : index
    %24 = memref.load %arg2[%c17] : memref<32xf32, #tpu.memory_space<smem>>
    %25 = vector.broadcast %24 : f32 to vector<8x2xf32>
    %26 = arith.mulf %25, %3 : vector<8x2xf32>
    %27 = arith.addf %23, %26 : vector<8x2xf32>
    %c1_9 = arith.constant 1 : index
    %28 = memref.load %arg3[%c1_9] : memref<16xf32, #tpu.memory_space<smem>>
    %29 = vector.broadcast %28 : f32 to vector<8x2xf32>
    %30 = arith.addf %27, %29 : vector<8x2xf32>
    %cst_10 = arith.constant 0.000000e+00 : f32
    %31 = vector.broadcast %cst_10 : f32 to vector<8x2xf32>
    %32 = arith.maximumf %30, %31 : vector<8x2xf32>
    %c1_11 = arith.constant 1 : index
    %33 = memref.load %arg4[%c1_11] : memref<16xf32, #tpu.memory_space<smem>>
    %34 = vector.broadcast %33 : f32 to vector<8x2xf32>
    %35 = arith.mulf %34, %32 : vector<8x2xf32>
    %36 = arith.addf %20, %35 : vector<8x2xf32>
    %c2 = arith.constant 2 : index
    %37 = memref.load %arg2[%c2] : memref<32xf32, #tpu.memory_space<smem>>
    %38 = vector.broadcast %37 : f32 to vector<8x2xf32>
    %39 = arith.mulf %38, %1 : vector<8x2xf32>
    %c18 = arith.constant 18 : index
    %40 = memref.load %arg2[%c18] : memref<32xf32, #tpu.memory_space<smem>>
    %41 = vector.broadcast %40 : f32 to vector<8x2xf32>
    %42 = arith.mulf %41, %3 : vector<8x2xf32>
    %43 = arith.addf %39, %42 : vector<8x2xf32>
    %c2_12 = arith.constant 2 : index
    %44 = memref.load %arg3[%c2_12] : memref<16xf32, #tpu.memory_space<smem>>
    %45 = vector.broadcast %44 : f32 to vector<8x2xf32>
    %46 = arith.addf %43, %45 : vector<8x2xf32>
    %cst_13 = arith.constant 0.000000e+00 : f32
    %47 = vector.broadcast %cst_13 : f32 to vector<8x2xf32>
    %48 = arith.maximumf %46, %47 : vector<8x2xf32>
    %c2_14 = arith.constant 2 : index
    %49 = memref.load %arg4[%c2_14] : memref<16xf32, #tpu.memory_space<smem>>
    %50 = vector.broadcast %49 : f32 to vector<8x2xf32>
    %51 = arith.mulf %50, %48 : vector<8x2xf32>
    %52 = arith.addf %36, %51 : vector<8x2xf32>
    %c3 = arith.constant 3 : index
    %53 = memref.load %arg2[%c3] : memref<32xf32, #tpu.memory_space<smem>>
    %54 = vector.broadcast %53 : f32 to vector<8x2xf32>
    %55 = arith.mulf %54, %1 : vector<8x2xf32>
    %c19 = arith.constant 19 : index
    %56 = memref.load %arg2[%c19] : memref<32xf32, #tpu.memory_space<smem>>
    %57 = vector.broadcast %56 : f32 to vector<8x2xf32>
    %58 = arith.mulf %57, %3 : vector<8x2xf32>
    %59 = arith.addf %55, %58 : vector<8x2xf32>
    %c3_15 = arith.constant 3 : index
    %60 = memref.load %arg3[%c3_15] : memref<16xf32, #tpu.memory_space<smem>>
    %61 = vector.broadcast %60 : f32 to vector<8x2xf32>
    %62 = arith.addf %59, %61 : vector<8x2xf32>
    %cst_16 = arith.constant 0.000000e+00 : f32
    %63 = vector.broadcast %cst_16 : f32 to vector<8x2xf32>
    %64 = arith.maximumf %62, %63 : vector<8x2xf32>
    %c3_17 = arith.constant 3 : index
    %65 = memref.load %arg4[%c3_17] : memref<16xf32, #tpu.memory_space<smem>>
    %66 = vector.broadcast %65 : f32 to vector<8x2xf32>
    %67 = arith.mulf %66, %64 : vector<8x2xf32>
    %68 = arith.addf %52, %67 : vector<8x2xf32>
    %c4 = arith.constant 4 : index
    %69 = memref.load %arg2[%c4] : memref<32xf32, #tpu.memory_space<smem>>
    %70 = vector.broadcast %69 : f32 to vector<8x2xf32>
    %71 = arith.mulf %70, %1 : vector<8x2xf32>
    %c20 = arith.constant 20 : index
    %72 = memref.load %arg2[%c20] : memref<32xf32, #tpu.memory_space<smem>>
    %73 = vector.broadcast %72 : f32 to vector<8x2xf32>
    %74 = arith.mulf %73, %3 : vector<8x2xf32>
    %75 = arith.addf %71, %74 : vector<8x2xf32>
    %c4_18 = arith.constant 4 : index
    %76 = memref.load %arg3[%c4_18] : memref<16xf32, #tpu.memory_space<smem>>
    %77 = vector.broadcast %76 : f32 to vector<8x2xf32>
    %78 = arith.addf %75, %77 : vector<8x2xf32>
    %cst_19 = arith.constant 0.000000e+00 : f32
    %79 = vector.broadcast %cst_19 : f32 to vector<8x2xf32>
    %80 = arith.maximumf %78, %79 : vector<8x2xf32>
    %c4_20 = arith.constant 4 : index
    %81 = memref.load %arg4[%c4_20] : memref<16xf32, #tpu.memory_space<smem>>
    %82 = vector.broadcast %81 : f32 to vector<8x2xf32>
    %83 = arith.mulf %82, %80 : vector<8x2xf32>
    %84 = arith.addf %68, %83 : vector<8x2xf32>
    %c5 = arith.constant 5 : index
    %85 = memref.load %arg2[%c5] : memref<32xf32, #tpu.memory_space<smem>>
    %86 = vector.broadcast %85 : f32 to vector<8x2xf32>
    %87 = arith.mulf %86, %1 : vector<8x2xf32>
    %c21 = arith.constant 21 : index
    %88 = memref.load %arg2[%c21] : memref<32xf32, #tpu.memory_space<smem>>
    %89 = vector.broadcast %88 : f32 to vector<8x2xf32>
    %90 = arith.mulf %89, %3 : vector<8x2xf32>
    %91 = arith.addf %87, %90 : vector<8x2xf32>
    %c5_21 = arith.constant 5 : index
    %92 = memref.load %arg3[%c5_21] : memref<16xf32, #tpu.memory_space<smem>>
    %93 = vector.broadcast %92 : f32 to vector<8x2xf32>
    %94 = arith.addf %91, %93 : vector<8x2xf32>
    %cst_22 = arith.constant 0.000000e+00 : f32
    %95 = vector.broadcast %cst_22 : f32 to vector<8x2xf32>
    %96 = arith.maximumf %94, %95 : vector<8x2xf32>
    %c5_23 = arith.constant 5 : index
    %97 = memref.load %arg4[%c5_23] : memref<16xf32, #tpu.memory_space<smem>>
    %98 = vector.broadcast %97 : f32 to vector<8x2xf32>
    %99 = arith.mulf %98, %96 : vector<8x2xf32>
    %100 = arith.addf %84, %99 : vector<8x2xf32>
    %c6 = arith.constant 6 : index
    %101 = memref.load %arg2[%c6] : memref<32xf32, #tpu.memory_space<smem>>
    %102 = vector.broadcast %101 : f32 to vector<8x2xf32>
    %103 = arith.mulf %102, %1 : vector<8x2xf32>
    %c22 = arith.constant 22 : index
    %104 = memref.load %arg2[%c22] : memref<32xf32, #tpu.memory_space<smem>>
    %105 = vector.broadcast %104 : f32 to vector<8x2xf32>
    %106 = arith.mulf %105, %3 : vector<8x2xf32>
    %107 = arith.addf %103, %106 : vector<8x2xf32>
    %c6_24 = arith.constant 6 : index
    %108 = memref.load %arg3[%c6_24] : memref<16xf32, #tpu.memory_space<smem>>
    %109 = vector.broadcast %108 : f32 to vector<8x2xf32>
    %110 = arith.addf %107, %109 : vector<8x2xf32>
    %cst_25 = arith.constant 0.000000e+00 : f32
    %111 = vector.broadcast %cst_25 : f32 to vector<8x2xf32>
    %112 = arith.maximumf %110, %111 : vector<8x2xf32>
    %c6_26 = arith.constant 6 : index
    %113 = memref.load %arg4[%c6_26] : memref<16xf32, #tpu.memory_space<smem>>
    %114 = vector.broadcast %113 : f32 to vector<8x2xf32>
    %115 = arith.mulf %114, %112 : vector<8x2xf32>
    %116 = arith.addf %100, %115 : vector<8x2xf32>
    %c7 = arith.constant 7 : index
    %117 = memref.load %arg2[%c7] : memref<32xf32, #tpu.memory_space<smem>>
    %118 = vector.broadcast %117 : f32 to vector<8x2xf32>
    %119 = arith.mulf %118, %1 : vector<8x2xf32>
    %c23 = arith.constant 23 : index
    %120 = memref.load %arg2[%c23] : memref<32xf32, #tpu.memory_space<smem>>
    %121 = vector.broadcast %120 : f32 to vector<8x2xf32>
    %122 = arith.mulf %121, %3 : vector<8x2xf32>
    %123 = arith.addf %119, %122 : vector<8x2xf32>
    %c7_27 = arith.constant 7 : index
    %124 = memref.load %arg3[%c7_27] : memref<16xf32, #tpu.memory_space<smem>>
    %125 = vector.broadcast %124 : f32 to vector<8x2xf32>
    %126 = arith.addf %123, %125 : vector<8x2xf32>
    %cst_28 = arith.constant 0.000000e+00 : f32
    %127 = vector.broadcast %cst_28 : f32 to vector<8x2xf32>
    %128 = arith.maximumf %126, %127 : vector<8x2xf32>
    %c7_29 = arith.constant 7 : index
    %129 = memref.load %arg4[%c7_29] : memref<16xf32, #tpu.memory_space<smem>>
    %130 = vector.broadcast %129 : f32 to vector<8x2xf32>
    %131 = arith.mulf %130, %128 : vector<8x2xf32>
    %132 = arith.addf %116, %131 : vector<8x2xf32>
    %c8 = arith.constant 8 : index
    %133 = memref.load %arg2[%c8] : memref<32xf32, #tpu.memory_space<smem>>
    %134 = vector.broadcast %133 : f32 to vector<8x2xf32>
    %135 = arith.mulf %134, %1 : vector<8x2xf32>
    %c24 = arith.constant 24 : index
    %136 = memref.load %arg2[%c24] : memref<32xf32, #tpu.memory_space<smem>>
    %137 = vector.broadcast %136 : f32 to vector<8x2xf32>
    %138 = arith.mulf %137, %3 : vector<8x2xf32>
    %139 = arith.addf %135, %138 : vector<8x2xf32>
    %c8_30 = arith.constant 8 : index
    %140 = memref.load %arg3[%c8_30] : memref<16xf32, #tpu.memory_space<smem>>
    %141 = vector.broadcast %140 : f32 to vector<8x2xf32>
    %142 = arith.addf %139, %141 : vector<8x2xf32>
    %cst_31 = arith.constant 0.000000e+00 : f32
    %143 = vector.broadcast %cst_31 : f32 to vector<8x2xf32>
    %144 = arith.maximumf %142, %143 : vector<8x2xf32>
    %c8_32 = arith.constant 8 : index
    %145 = memref.load %arg4[%c8_32] : memref<16xf32, #tpu.memory_space<smem>>
    %146 = vector.broadcast %145 : f32 to vector<8x2xf32>
    %147 = arith.mulf %146, %144 : vector<8x2xf32>
    %148 = arith.addf %132, %147 : vector<8x2xf32>
    %c9 = arith.constant 9 : index
    %149 = memref.load %arg2[%c9] : memref<32xf32, #tpu.memory_space<smem>>
    %150 = vector.broadcast %149 : f32 to vector<8x2xf32>
    %151 = arith.mulf %150, %1 : vector<8x2xf32>
    %c25 = arith.constant 25 : index
    %152 = memref.load %arg2[%c25] : memref<32xf32, #tpu.memory_space<smem>>
    %153 = vector.broadcast %152 : f32 to vector<8x2xf32>
    %154 = arith.mulf %153, %3 : vector<8x2xf32>
    %155 = arith.addf %151, %154 : vector<8x2xf32>
    %c9_33 = arith.constant 9 : index
    %156 = memref.load %arg3[%c9_33] : memref<16xf32, #tpu.memory_space<smem>>
    %157 = vector.broadcast %156 : f32 to vector<8x2xf32>
    %158 = arith.addf %155, %157 : vector<8x2xf32>
    %cst_34 = arith.constant 0.000000e+00 : f32
    %159 = vector.broadcast %cst_34 : f32 to vector<8x2xf32>
    %160 = arith.maximumf %158, %159 : vector<8x2xf32>
    %c9_35 = arith.constant 9 : index
    %161 = memref.load %arg4[%c9_35] : memref<16xf32, #tpu.memory_space<smem>>
    %162 = vector.broadcast %161 : f32 to vector<8x2xf32>
    %163 = arith.mulf %162, %160 : vector<8x2xf32>
    %164 = arith.addf %148, %163 : vector<8x2xf32>
    %c10 = arith.constant 10 : index
    %165 = memref.load %arg2[%c10] : memref<32xf32, #tpu.memory_space<smem>>
    %166 = vector.broadcast %165 : f32 to vector<8x2xf32>
    %167 = arith.mulf %166, %1 : vector<8x2xf32>
    %c26 = arith.constant 26 : index
    %168 = memref.load %arg2[%c26] : memref<32xf32, #tpu.memory_space<smem>>
    %169 = vector.broadcast %168 : f32 to vector<8x2xf32>
    %170 = arith.mulf %169, %3 : vector<8x2xf32>
    %171 = arith.addf %167, %170 : vector<8x2xf32>
    %c10_36 = arith.constant 10 : index
    %172 = memref.load %arg3[%c10_36] : memref<16xf32, #tpu.memory_space<smem>>
    %173 = vector.broadcast %172 : f32 to vector<8x2xf32>
    %174 = arith.addf %171, %173 : vector<8x2xf32>
    %cst_37 = arith.constant 0.000000e+00 : f32
    %175 = vector.broadcast %cst_37 : f32 to vector<8x2xf32>
    %176 = arith.maximumf %174, %175 : vector<8x2xf32>
    %c10_38 = arith.constant 10 : index
    %177 = memref.load %arg4[%c10_38] : memref<16xf32, #tpu.memory_space<smem>>
    %178 = vector.broadcast %177 : f32 to vector<8x2xf32>
    %179 = arith.mulf %178, %176 : vector<8x2xf32>
    %180 = arith.addf %164, %179 : vector<8x2xf32>
    %c11 = arith.constant 11 : index
    %181 = memref.load %arg2[%c11] : memref<32xf32, #tpu.memory_space<smem>>
    %182 = vector.broadcast %181 : f32 to vector<8x2xf32>
    %183 = arith.mulf %182, %1 : vector<8x2xf32>
    %c27 = arith.constant 27 : index
    %184 = memref.load %arg2[%c27] : memref<32xf32, #tpu.memory_space<smem>>
    %185 = vector.broadcast %184 : f32 to vector<8x2xf32>
    %186 = arith.mulf %185, %3 : vector<8x2xf32>
    %187 = arith.addf %183, %186 : vector<8x2xf32>
    %c11_39 = arith.constant 11 : index
    %188 = memref.load %arg3[%c11_39] : memref<16xf32, #tpu.memory_space<smem>>
    %189 = vector.broadcast %188 : f32 to vector<8x2xf32>
    %190 = arith.addf %187, %189 : vector<8x2xf32>
    %cst_40 = arith.constant 0.000000e+00 : f32
    %191 = vector.broadcast %cst_40 : f32 to vector<8x2xf32>
    %192 = arith.maximumf %190, %191 : vector<8x2xf32>
    %c11_41 = arith.constant 11 : index
    %193 = memref.load %arg4[%c11_41] : memref<16xf32, #tpu.memory_space<smem>>
    %194 = vector.broadcast %193 : f32 to vector<8x2xf32>
    %195 = arith.mulf %194, %192 : vector<8x2xf32>
    %196 = arith.addf %180, %195 : vector<8x2xf32>
    %c12 = arith.constant 12 : index
    %197 = memref.load %arg2[%c12] : memref<32xf32, #tpu.memory_space<smem>>
    %198 = vector.broadcast %197 : f32 to vector<8x2xf32>
    %199 = arith.mulf %198, %1 : vector<8x2xf32>
    %c28 = arith.constant 28 : index
    %200 = memref.load %arg2[%c28] : memref<32xf32, #tpu.memory_space<smem>>
    %201 = vector.broadcast %200 : f32 to vector<8x2xf32>
    %202 = arith.mulf %201, %3 : vector<8x2xf32>
    %203 = arith.addf %199, %202 : vector<8x2xf32>
    %c12_42 = arith.constant 12 : index
    %204 = memref.load %arg3[%c12_42] : memref<16xf32, #tpu.memory_space<smem>>
    %205 = vector.broadcast %204 : f32 to vector<8x2xf32>
    %206 = arith.addf %203, %205 : vector<8x2xf32>
    %cst_43 = arith.constant 0.000000e+00 : f32
    %207 = vector.broadcast %cst_43 : f32 to vector<8x2xf32>
    %208 = arith.maximumf %206, %207 : vector<8x2xf32>
    %c12_44 = arith.constant 12 : index
    %209 = memref.load %arg4[%c12_44] : memref<16xf32, #tpu.memory_space<smem>>
    %210 = vector.broadcast %209 : f32 to vector<8x2xf32>
    %211 = arith.mulf %210, %208 : vector<8x2xf32>
    %212 = arith.addf %196, %211 : vector<8x2xf32>
    %c13 = arith.constant 13 : index
    %213 = memref.load %arg2[%c13] : memref<32xf32, #tpu.memory_space<smem>>
    %214 = vector.broadcast %213 : f32 to vector<8x2xf32>
    %215 = arith.mulf %214, %1 : vector<8x2xf32>
    %c29 = arith.constant 29 : index
    %216 = memref.load %arg2[%c29] : memref<32xf32, #tpu.memory_space<smem>>
    %217 = vector.broadcast %216 : f32 to vector<8x2xf32>
    %218 = arith.mulf %217, %3 : vector<8x2xf32>
    %219 = arith.addf %215, %218 : vector<8x2xf32>
    %c13_45 = arith.constant 13 : index
    %220 = memref.load %arg3[%c13_45] : memref<16xf32, #tpu.memory_space<smem>>
    %221 = vector.broadcast %220 : f32 to vector<8x2xf32>
    %222 = arith.addf %219, %221 : vector<8x2xf32>
    %cst_46 = arith.constant 0.000000e+00 : f32
    %223 = vector.broadcast %cst_46 : f32 to vector<8x2xf32>
    %224 = arith.maximumf %222, %223 : vector<8x2xf32>
    %c13_47 = arith.constant 13 : index
    %225 = memref.load %arg4[%c13_47] : memref<16xf32, #tpu.memory_space<smem>>
    %226 = vector.broadcast %225 : f32 to vector<8x2xf32>
    %227 = arith.mulf %226, %224 : vector<8x2xf32>
    %228 = arith.addf %212, %227 : vector<8x2xf32>
    %c14 = arith.constant 14 : index
    %229 = memref.load %arg2[%c14] : memref<32xf32, #tpu.memory_space<smem>>
    %230 = vector.broadcast %229 : f32 to vector<8x2xf32>
    %231 = arith.mulf %230, %1 : vector<8x2xf32>
    %c30 = arith.constant 30 : index
    %232 = memref.load %arg2[%c30] : memref<32xf32, #tpu.memory_space<smem>>
    %233 = vector.broadcast %232 : f32 to vector<8x2xf32>
    %234 = arith.mulf %233, %3 : vector<8x2xf32>
    %235 = arith.addf %231, %234 : vector<8x2xf32>
    %c14_48 = arith.constant 14 : index
    %236 = memref.load %arg3[%c14_48] : memref<16xf32, #tpu.memory_space<smem>>
    %237 = vector.broadcast %236 : f32 to vector<8x2xf32>
    %238 = arith.addf %235, %237 : vector<8x2xf32>
    %cst_49 = arith.constant 0.000000e+00 : f32
    %239 = vector.broadcast %cst_49 : f32 to vector<8x2xf32>
    %240 = arith.maximumf %238, %239 : vector<8x2xf32>
    %c14_50 = arith.constant 14 : index
    %241 = memref.load %arg4[%c14_50] : memref<16xf32, #tpu.memory_space<smem>>
    %242 = vector.broadcast %241 : f32 to vector<8x2xf32>
    %243 = arith.mulf %242, %240 : vector<8x2xf32>
    %244 = arith.addf %228, %243 : vector<8x2xf32>
    %c15 = arith.constant 15 : index
    %245 = memref.load %arg2[%c15] : memref<32xf32, #tpu.memory_space<smem>>
    %246 = vector.broadcast %245 : f32 to vector<8x2xf32>
    %247 = arith.mulf %246, %1 : vector<8x2xf32>
    %c31 = arith.constant 31 : index
    %248 = memref.load %arg2[%c31] : memref<32xf32, #tpu.memory_space<smem>>
    %249 = vector.broadcast %248 : f32 to vector<8x2xf32>
    %250 = arith.mulf %249, %3 : vector<8x2xf32>
    %251 = arith.addf %247, %250 : vector<8x2xf32>
    %c15_51 = arith.constant 15 : index
    %252 = memref.load %arg3[%c15_51] : memref<16xf32, #tpu.memory_space<smem>>
    %253 = vector.broadcast %252 : f32 to vector<8x2xf32>
    %254 = arith.addf %251, %253 : vector<8x2xf32>
    %cst_52 = arith.constant 0.000000e+00 : f32
    %255 = vector.broadcast %cst_52 : f32 to vector<8x2xf32>
    %256 = arith.maximumf %254, %255 : vector<8x2xf32>
    %c15_53 = arith.constant 15 : index
    %257 = memref.load %arg4[%c15_53] : memref<16xf32, #tpu.memory_space<smem>>
    %258 = vector.broadcast %257 : f32 to vector<8x2xf32>
    %259 = arith.mulf %258, %256 : vector<8x2xf32>
    %260 = arith.addf %244, %259 : vector<8x2xf32>
    %c0_54 = arith.constant 0 : index
    %261 = memref.load %arg5[%c0_54] : memref<1xf32, #tpu.memory_space<smem>>
    %262 = vector.broadcast %261 : f32 to vector<8x2xf32>
    %263 = arith.addf %260, %262 : vector<8x2xf32>
    %264 = tpu.iota {dimensions = array<i32: 0>} : vector<8x2xi32>
    %265 = tpu.iota {dimensions = array<i32: 1>} : vector<8x2xi32>
    %c0_i32 = arith.constant 0 : i32
    %266 = vector.broadcast %c0_i32 : i32 to vector<8x2xi32>
    %267 = arith.addi %265, %266 : vector<8x2xi32>
    %c2_i32 = arith.constant 2 : i32
    %268 = vector.broadcast %c2_i32 : i32 to vector<8x2xi32>
    %269 = arith.muli %264, %268 : vector<8x2xi32>
    %270 = arith.addi %269, %267 : vector<8x2xi32>
    %c13_i32 = arith.constant 13 : i32
    %271 = vector.broadcast %c13_i32 : i32 to vector<8x2xi32>
    %272 = arith.cmpi slt, %270, %271 : vector<8x2xi32>
    %cst_55 = arith.constant 0xFF800000 : f32
    %273 = vector.broadcast %cst_55 : f32 to vector<8x2xf32>
    %274 = arith.select %272, %263, %273 : vector<8x2xi1>, vector<8x2xf32>
    %cst_56 = arith.constant dense<0xFF800000> : vector<8xf32>
    %275 = vector.multi_reduction <maximumf>, %274, %cst_56 [1] : vector<8x2xf32> to vector<8xf32>
    %276 = vector.shape_cast %275 : vector<8xf32> to vector<8x1xf32>
    %cst_57 = arith.constant dense<0xFF800000> : vector<1xf32>
    %277 = vector.multi_reduction <maximumf>, %276, %cst_57 [0] : vector<8x1xf32> to vector<1xf32>
    %278 = vector.shape_cast %277 : vector<1xf32> to vector<1x1xf32>
    %279 = vector.broadcast %278 : vector<1x1xf32> to vector<8x2xf32>
    %280 = arith.subf %274, %279 : vector<8x2xf32>
    %281 = math.exp %280 : vector<8x2xf32>
    %cst_58 = arith.constant dense<0.000000e+00> : vector<8xf32>
    %282 = vector.multi_reduction <add>, %281, %cst_58 [1] : vector<8x2xf32> to vector<8xf32>
    %283 = vector.shape_cast %282 : vector<8xf32> to vector<8x1xf32>
    %cst_59 = arith.constant dense<0.000000e+00> : vector<1xf32>
    %284 = vector.multi_reduction <add>, %283, %cst_59 [0] : vector<8x1xf32> to vector<1xf32>
    %285 = vector.shape_cast %284 : vector<1xf32> to vector<1x1xf32>
    %286 = tpu.reciprocal %285 : vector<1x1xf32> -> vector<1x1xf32>
    %287 = vector.broadcast %286 : vector<1x1xf32> to vector<8x2xf32>
    %288 = arith.mulf %281, %287 : vector<8x2xf32>
    %c0_60 = arith.constant 0 : index
    %c0_61 = arith.constant 0 : index
    %289 = vector.load %arg6[%c0_60, %c0_61] : memref<8x2xf32, #tpu.memory_space<vmem>>, vector<8x2xf32>
    tpu.vector_store %arg6[%c0_60, %c0_61], %288 {strides = array<i32>} : memref<8x2xf32, #tpu.memory_space<vmem>>, vector<8x2xf32>,
    return
  }
  func.func @transform_0(%arg0: i32) -> (i32, i32, i32) {
    %c0_i32 = arith.constant 0 : i32
    %c0_i32_0 = arith.constant 0 : i32
    %c0_i32_1 = arith.constant 0 : i32
    %c0_i32_2 = arith.constant 0 : i32
    return %c0_i32, %c0_i32_0, %c0_i32_1 : i32, i32, i32
  }
  func.func @transform_1(%arg0: i32) -> i32 {
    %c0_i32 = arith.constant 0 : i32
    %c0_i32_0 = arith.constant 0 : i32
    return %c0_i32 : i32
  }
  func.func @transform_2(%arg0: i32) -> i32 {
    %c0_i32 = arith.constant 0 : i32
    %c0_i32_0 = arith.constant 0 : i32
    return %c0_i32 : i32
  }
  func.func @transform_3(%arg0: i32) -> i32 {
    %c0_i32 = arith.constant 0 : i32
    %c0_i32_0 = arith.constant 0 : i32
    return %c0_i32 : i32
  }
  func.func @transform_4(%arg0: i32) -> i32 {
    %c0_i32 = arith.constant 0 : i32
    %c0_i32_0 = arith.constant 0 : i32
    return %c0_i32 : i32
  }
  func.func @transform_5(%arg0: i32) -> (i32, i32) {
    %c0_i32 = arith.constant 0 : i32
    %c0_i32_0 = arith.constant 0 : i32
    %c0_i32_1 = arith.constant 0 : i32
    return %c0_i32, %c0_i32_0 : i32, i32
  }
}

</mosaic_0001>

<bundles_post_ra>
// kernel: tpu_custom_call.1
= control target key start
LH: loop header
LB: loop body
LE: loop exit
PB: predicated region body
PF: predicated region fallthrough
CT: control target
= control target key end

     0   :  { %11 = vsyncpa [#allocation4], 0  ;;  %s726_s0 = inlined_call_operand.vmem [shape: f32[2,8,2], index: 0, kind: input, shape index: {}]   ;;  %s727_s1 = inlined_call_operand.vmem [shape: f32[32], index: 1, kind: input, shape index: {}]   ;;  %s728_s2 = inlined_call_operand.vmem [shape: f32[16], index: 2, kind: input, shape index: {}]   ;;  %s729_s3 = inlined_call_operand.vmem [shape: f32[16], index: 3, kind: input, shape index: {}]   ;;  %s730_s4 = inlined_call_operand.<no memory space> [shape: f32[1], index: 4, kind: input, shape index: {}]   ;;  %s731_s5 = inlined_call_operand.vmem [shape: f32[8,2], index: 5, kind: output, shape index: {}]  }
   0x1   :  { %12 = vsyncpa [#allocation6], 0  ;;  %s31_s20 = sshll.u32 %s728_s2, 4  ;;  %s21_s23 = sshll.u32 %s727_s1, 4  ;;  %s32_s20 = int_to_ptr.vmem [resolvable:$true] %s31_s20  ;;  %s22_s23 = int_to_ptr.vmem [resolvable:$true] %s21_s23 }
   0x2   :  { %s411_s24 = scalar_lea.vmem %s32_s20, 16  ;;  %p416_p1 = scmp.lt.s32.totalorder %s32_s20, %s32_s20 }
   0x3   :  { %p412_p0 = scmp.ne.s32.totalorder %s32_s20, %s411_s24  ;;  %p417_p2 = scmp.lt.s32.totalorder %s411_s24, %s411_s24 }
   0x5   :  { %p418_p3 = por %p417_p2, %p416_p1 }
   0x7   :  { %p419_p4 = pnand %p418_p3, %p412_p0 }
   0x9   :  { %422 = shalt.err (!%p419_p4)
}
   0xa   :  { %s451_s25 = smov [#allocation5]   ;;  %s423_s26 = scalar_lea.vmem %s22_s23, 16 }
   0xb   :  { %34 = dma.vmem_to_smem %s32_s20, 16, %s451_s25, [#allocation6]  }
   0xc   :  { %p424_p5 = scmp.ne.s32.totalorder %s22_s23, %s423_s26  ;;  %p428_p6 = scmp.lt.s32.totalorder %s22_s23, %s22_s23 }
   0xd   :  { %p429_p7 = scmp.lt.s32.totalorder %s423_s26, %s423_s26 }
   0xf   :  { %p430_p8 = por %p429_p7, %p428_p6 }
  0x11   :  { %p431_p9 = pnand %p430_p8, %p424_p5 }
  0x13   :  { %434 = shalt.err (!%p431_p9)
}
  0x14   :  { %s452_s2 = smov [#allocation3]   ;;  %s41_s28 = sshll.u32 %s729_s3, 4  ;;  %s42_s28 = int_to_ptr.vmem [resolvable:$true] %s41_s28 }
  0x15   :  { %24 = dma.vmem_to_smem %s22_s23, 16, %s452_s2, [#allocation4]  }
  0x16   :  { %s435_s29 = scalar_lea.vmem %s42_s28, 16  ;;  %p440_p11 = scmp.lt.s32.totalorder %s42_s28, %s42_s28 }
  0x17   :  { %p436_p10 = scmp.ne.s32.totalorder %s42_s28, %s435_s29  ;;  %p441_p12 = scmp.lt.s32.totalorder %s435_s29, %s435_s29 }
  0x19   :  { %p442_p13 = por %p441_p12, %p440_p11 }
  0x1b   :  { %p443_p0 = pnand %p442_p13, %p436_p10 }
  0x1d   :  { %446 = shalt.err (!%p443_p0)
}
  0x1e   :  { %s453_s30 = smov [#allocation7]  }
  0x1f   :  { %44 = dma.vmem_to_smem %s42_s28, 16, %s453_s30, [#allocation6]  }
  0x20   :  { %447 = dma.done.wait [#allocation4], 16  }
  0x21   :  { %448 = vsyncadd [#allocation4], 4294967280 }
  0x22   :  { %449 = dma.done.wait [#allocation6], 32  }
  0x23   :  { %450 = vsyncadd [#allocation6], 4294967264 }
  0x24   :  { %56 = sfence }
  0x25   :  { %s60_s6 = sld [smem:[#allocation3]]  ;;  %s344_s9 = sld [smem:[#allocation3 + $0x1]]  ;;  %v504_v0 = vld [vmem:[%s726_s0] sm:$0xff]  ;;  %v509_v1 = vld [vmem:[%s726_s0 + $0x8] sm:$0xff]  ;;  %v303_v12 = vlaneseq  ;;  %vm311_vm1 = vcmask 15360  }
  0x26   :  { %s343_s7 = sld [smem:[#allocation3 + $0x10]]  ;;  %s345_s10 = sld [smem:[#allocation3 + $0x11]] }
  0x27   :  { %s493_s8 = sld [smem:[#allocation5]]  ;;  %s497_s11 = sld [smem:[#allocation5 + $0x1]] }
  0x28   :  { %s495_s3 = sld [smem:[#allocation7]]  ;;  %s499_s12 = sld [smem:[#allocation7 + $0x1]] }
  0x29   :  { %s511_s17 = sld [smem:[#allocation3 + $0x2]]  ;;  %s519_s21 = sld [smem:[#allocation3 + $0x3]] }
  0x2a   :  { %s513_s18 = sld [smem:[#allocation3 + $0x12]]  ;;  %s521_s22 = sld [smem:[#allocation3 + $0x13]] }
  0x2b   :  { %s515_s19 = sld [smem:[#allocation5 + $0x2]]  ;;  %v61_v2 = vstv %s60_s6  ;;  %s525_s0 = sld [smem:[#allocation5 + $0x3]]  ;;  %v76_v7 = vstv %s344_s9 }
  0x2c   :  { %s517_s20 = sld [smem:[#allocation7 + $0x2]]  ;;  %v64_v3 = vstv %s343_s7  ;;  %v62_v4 = vmul.f32 %v61_v2, %v504_v0  ;;  %s527_s23 = sld [smem:[#allocation7 + $0x3]]  ;;  %v79_v8 = vstv %s345_s10  ;;  %v77_v10 = vmul.f32 %v76_v7, %v504_v0 }
  0x2d   :  { %v65_v5 = vmul.f32 %v509_v1, %v64_v3  ;;  %v68_v6 = vstv %s493_s8  ;;  %s530_s24 = sld [smem:[#allocation3 + $0x4]]  ;;  %v80_v11 = vmul.f32 %v509_v1, %v79_v8  ;;  %v83_v14 = vstv %s497_s11  ;;  %s544_s1 = sld [smem:[#allocation3 + $0x5]] }
  0x2e   :  { %s532_s25 = sld [smem:[#allocation3 + $0x14]]  ;;  %v72_v13 = vstv %s495_s3  ;;  %s546_s27 = sld [smem:[#allocation3 + $0x15]]  ;;  %v87_v21 = vstv %s499_s12 }
  0x2f   :  { %v66_v9 = vadd.f32 %v65_v5, %v62_v4  ;;  %s536_s26 = sld [smem:[#allocation5 + $0x4]]  ;;  %v91_v15 = vstv %s511_s17  ;;  %v81_v18 = vadd.f32 %v80_v11, %v77_v10  ;;  %s550_s28 = sld [smem:[#allocation5 + $0x5]]  ;;  %v106_v23 = vstv %s519_s21 }
  0x30   :  { %s538_s2 = sld [smem:[#allocation7 + $0x4]]  ;;  %v94_v16 = vstv %s513_s18  ;;  %v92_v19 = vmul.f32 %v91_v15, %v504_v0  ;;  %v109_v24 = vstv %s521_s22  ;;  %s556_s29 = sld [smem:[#allocation3 + $0x6]]  ;;  %v107_v28 = vmul.f32 %v106_v23, %v504_v0 }
  0x31   :  { %v69_v17 = vadd.f32 %v68_v6, %v66_v9  ;;  %v95_v20 = vmul.f32 %v509_v1, %v94_v16  ;;  %v98_v22 = vstv %s515_s19  ;;  %s558_s30 = sld [smem:[#allocation3 + $0x16]]  ;;  %v84_v26 = vadd.f32 %v83_v14, %v81_v18  ;;  %s565_s6 = sld [smem:[#allocation7 + $0x5]] }
  0x32   :  { %v102_v29 = vstv %s517_s20  ;;  %v110_v30 = vmul.f32 %v509_v1, %v109_v24  ;;  %v113_v31 = vstv %s525_s0  ;;  %s567_s7 = sld [smem:[#allocation5 + $0x6]]  ;;  %s570_s8 = sld [smem:[#allocation3 + $0x7]]  ;;  %v117_v38 = vstv %s527_s23 }
  0x33   :  { %v70_v25 = vmax.f32 %v69_v17, 0.0  ;;  %v96_v27 = vadd.f32 %v95_v20, %v92_v19  ;;  %v121_v32 = vstv %s530_s24  ;;  %v85_v34 = vmax.f32 %v84_v26, 0.0  ;;  %s572_s3 = sld [smem:[#allocation3 + $0x17]]  ;;  %s579_s9 = sld [smem:[#allocation7 + $0x6]] }
  0x34   :  { %v122_v36 = vmul.f32 %v121_v32, %v504_v0  ;;  %v111_v37 = vadd.f32 %v110_v30, %v107_v28  ;;  %v124_v39 = vstv %s532_s25  ;;  %v136_v44 = vstv %s544_s1  ;;  %s581_s10 = sld [smem:[#allocation5 + $0x7]]  ;;  %s586_s11 = sld [smem:[#allocation3 + $0x8]] }
  0x35   :  { %v73_v33 = vmul.f32 %v72_v13, %v70_v25  ;;  %v99_v35 = vadd.f32 %v98_v22, %v96_v27  ;;  %v128_v40 = vstv %s536_s26  ;;  %v88_v41 = vmul.f32 %v87_v21, %v85_v34  ;;  %s588_s12 = sld [smem:[#allocation3 + $0x18]]  ;;  %s594_s13 = sld [smem:[#allocation7 + $0x7]] }
  0x36   :  { %v125_v43 = vmul.f32 %v509_v1, %v124_v39  ;;  %v114_v45 = vadd.f32 %v113_v31, %v111_v37  ;;  %v132_v46 = vstv %s538_s2  ;;  %v137_v47 = vmul.f32 %v136_v44, %v504_v0  ;;  %s596_s14 = sld [smem:[#allocation5 + $0x8]]  ;;  %s599_s15 = sld [smem:[#allocation3 + $0x9]] }
  0x37   :  { %v100_v42 = vmax.f32 %v99_v35, 0.0  ;;  %v139_v48 = vstv %s546_s27  ;;  %v89_v49 = vadd.f32 %v88_v41, %v73_v33  ;;  %v143_v54 = vstv %s550_s28  ;;  %s601_s16 = sld [smem:[#allocation3 + $0x19]]  ;;  %s606_s17 = sld [smem:[#allocation7 + $0x8]] }
  0x38   :  { %v126_v51 = vadd.f32 %v125_v43, %v122_v36  ;;  %v140_v52 = vmul.f32 %v509_v1, %v139_v48  ;;  %v115_v53 = vmax.f32 %v114_v45, 0.0  ;;  %v151_v55 = vstv %s556_s29  ;;  %s610_s18 = sld [smem:[#allocation5 + $0x9]]  ;;  %s612_s19 = sld [smem:[#allocation3 + $0xa]] }
  0x39   :  { %v103_v50 = vmul.f32 %v102_v29, %v100_v42  ;;  %v154_v56 = vstv %s558_s30  ;;  %v152_v60 = vmul.f32 %v151_v55, %v504_v0  ;;  %v147_v62 = vstv %s565_s6  ;;  %s618_s20 = sld [smem:[#allocation7 + $0x9]]  ;;  %s620_s21 = sld [smem:[#allocation3 + $0x1a]] }
  0x3a   :  { %v129_v58 = vadd.f32 %v128_v40, %v126_v51  ;;  %v141_v59 = vadd.f32 %v140_v52, %v137_v47  ;;  %v118_v61 = vmul.f32 %v117_v38, %v115_v53  ;;  %v155_v63 = vmul.f32 %v509_v1, %v154_v56  ;;  %s624_s22 = sld [smem:[#allocation3 + $0xb]]  ;;  %s628_s0 = sld [smem:[#allocation5 + $0xa]] }
  0x3b   :  { %v104_v57 = vadd.f32 %v103_v50, %v89_v49  ;;  %v158_v2 = vstv %s567_s7  ;;  %v166_v5 = vstv %s570_s8  ;;  %v169_v6 = vstv %s572_s3  ;;  %s630_s23 = sld [smem:[#allocation3 + $0x1b]]  ;;  %s634_s24 = sld [smem:[#allocation7 + $0xa]] }
  0x3c   :  { %v130_v3 = vmax.f32 %v129_v58, 0.0  ;;  %v144_v4 = vadd.f32 %v143_v54, %v141_v59  ;;  %v156_v8 = vadd.f32 %v155_v63, %v152_v60  ;;  %v167_v9 = vmul.f32 %v166_v5, %v504_v0  ;;  %s636_s25 = sld [smem:[#allocation5 + $0xb]]  ;;  %s640_s26 = sld [smem:[#allocation3 + $0xc]] }
  0x3d   :  { %v119_v7 = vadd.f32 %v118_v61, %v104_v57  ;;  %v170_v10 = vmul.f32 %v509_v1, %v169_v6  ;;  %v162_v14 = vstv %s579_s9  ;;  %v173_v15 = vstv %s581_s10  ;;  %s642_s2 = sld [smem:[#allocation3 + $0x1c]]  ;;  %s651_s27 = sld [smem:[#allocation3 + $0xd]] }
  0x3e   :  { %v133_v11 = vmul.f32 %v132_v46, %v130_v3  ;;  %v145_v13 = vmax.f32 %v144_v4, 0.0  ;;  %v159_v16 = vadd.f32 %v158_v2, %v156_v8  ;;  %v181_v18 = vstv %s586_s11  ;;  %s646_s1 = sld [smem:[#allocation5 + $0xc]]  ;;  %s653_s28 = sld [smem:[#allocation3 + $0x1d]] }
  0x3f   :  { %v171_v17 = vadd.f32 %v170_v10, %v167_v9  ;;  %v184_v19 = vstv %s588_s12  ;;  %v182_v22 = vmul.f32 %v181_v18, %v504_v0  ;;  %v177_v26 = vstv %s594_s13  ;;  %s658_s29 = sld [smem:[#allocation7 + $0xb]]  ;;  %s660_s30 = sld [smem:[#allocation5 + $0xd]] }
  0x40   :  { %v134_v20 = vadd.f32 %v133_v11, %v119_v7  ;;  %v148_v21 = vmul.f32 %v147_v62, %v145_v13  ;;  %v185_v23 = vmul.f32 %v509_v1, %v184_v19  ;;  %v160_v24 = vmax.f32 %v159_v16, 0.0  ;;  %s667_s6 = sld [smem:[#allocation3 + $0xe]]  ;;  %s676_s8 = sld [smem:[#allocation7 + $0xc]] }
  0x41   :  { %v174_v25 = vadd.f32 %v173_v15, %v171_v17  ;;  %v188_v27 = vstv %s596_s14  ;;  %v196_v30 = vstv %s599_s15  ;;  %v199_v31 = vstv %s601_s16  ;;  %s669_s7 = sld [smem:[#allocation3 + $0x1e]]  ;;  %s683_s9 = sld [smem:[#allocation3 + $0xf]] }
  0x42   :  { %v149_v28 = vadd.f32 %v148_v21, %v134_v20  ;;  %v186_v29 = vadd.f32 %v185_v23, %v182_v22  ;;  %v163_v32 = vmul.f32 %v162_v14, %v160_v24  ;;  %v197_v34 = vmul.f32 %v196_v30, %v504_v0  ;;  %s678_s3 = sld [smem:[#allocation5 + $0xe]]  ;;  %s686_s10 = sld [smem:[#allocation7 + $0xd]] }
  0x43   :  { %v175_v33 = vmax.f32 %v174_v25, 0.0  ;;  %v200_v35 = vmul.f32 %v509_v1, %v199_v31  ;;  %v192_v37 = vstv %s606_s17  ;;  %v203_v38 = vstv %s610_s18  ;;  %s688_s11 = sld [smem:[#allocation3 + $0x1f]]  ;;  %s695_s12 = sld [smem:[#allocation7 + $0xe]] }
  0x44   :  { %v189_v36 = vadd.f32 %v188_v27, %v186_v29  ;;  %v211_v39 = vstv %s612_s19  ;;  %v164_v40 = vadd.f32 %v163_v32, %v149_v28  ;;  %v207_v45 = vstv %s618_s20  ;;  %s697_s13 = sld [smem:[#allocation5 + $0xf]] }
  0x45   :  { %v178_v41 = vmul.f32 %v177_v26, %v175_v33  ;;  %v201_v42 = vadd.f32 %v200_v35, %v197_v34  ;;  %v212_v43 = vmul.f32 %v211_v39, %v504_v0  ;;  %v214_v46 = vstv %s620_s21  ;;  %s403_s14 = sld [smem:[#allocation7 + $0xf]] }
  0x46   :  { %v190_v44 = vmax.f32 %v189_v36, 0.0  ;;  %v663_v47 = vshrl.u32 %v303_v12, 7  ;;  %v215_v50 = vmul.f32 %v509_v1, %v214_v46  ;;  %v226_v51 = vstv %s624_s22 }
  0x47   :  { %v179_v48 = vadd.f32 %v178_v41, %v164_v40  ;;  %v204_v49 = vadd.f32 %v203_v38, %v201_v42  ;;  %v218_v53 = vstv %s628_s0  ;;  %v227_v54 = vmul.f32 %v226_v51, %v504_v0 }
  0x48   :  { %v193_v52 = vmul.f32 %v192_v37, %v190_v44  ;;  %v229_v55 = vstv %s630_s23  ;;  %v216_v57 = vadd.f32 %v215_v50, %v212_v43  ;;  %v222_v58 = vstv %s634_s24 }
  0x49   :  { %v205_v56 = vmax.f32 %v204_v49, 0.0  ;;  %v230_v59 = vmul.f32 %v509_v1, %v229_v55  ;;  %v233_v61 = vstv %s636_s25  ;;  %v241_v62 = vstv %s640_s26 }
  0x4a   :  { %v194_v60 = vadd.f32 %v193_v52, %v179_v48  ;;  %v244_v63 = vstv %s642_s2  ;;  %v219_v3 = vadd.f32 %v218_v53, %v216_v57  ;;  %v242_v5 = vmul.f32 %v241_v62, %v504_v0 }
  0x4b   :  { %v208_v2 = vmul.f32 %v207_v45, %v205_v56  ;;  %v231_v4 = vadd.f32 %v230_v59, %v227_v54  ;;  %v245_v6 = vmul.f32 %v509_v1, %v244_v63  ;;  %v248_v7 = vstv %s646_s1 }
  0x4c   :  { %v256_v8 = vstv %s651_s27  ;;  %v259_v9 = vstv %s653_s28  ;;  %v220_v11 = vmax.f32 %v219_v3, 0.0  ;;  %v237_v15 = vstv %s658_s29 }
  0x4d   :  { %v209_v10 = vadd.f32 %v208_v2, %v194_v60  ;;  %v234_v13 = vadd.f32 %v233_v61, %v231_v4  ;;  %v257_v14 = vmul.f32 %v256_v8, %v504_v0  ;;  %v246_v16 = vadd.f32 %v245_v6, %v242_v5 }
  0x4e   :  { %v260_v17 = vmul.f32 %v509_v1, %v259_v9  ;;  %v263_v18 = vstv %s660_s30  ;;  %v223_v19 = vmul.f32 %v222_v58, %v220_v11  ;;  %v271_v21 = vstv %s667_s6 }
  0x4f   :  { %v235_v20 = vmax.f32 %v234_v13, 0.0  ;;  %v274_v22 = vstv %s669_s7  ;;  %v249_v23 = vadd.f32 %v248_v7, %v246_v16  ;;  %v272_v25 = vmul.f32 %v271_v21, %v504_v0 }
  0x50   :  { %v261_v24 = vadd.f32 %v260_v17, %v257_v14  ;;  %v275_v26 = vmul.f32 %v509_v1, %v274_v22  ;;  %v224_v27 = vadd.f32 %v223_v19, %v209_v10  ;;  %v252_v29 = vstv %s676_s8 }
  0x51   :  { %v238_v28 = vmul.f32 %v237_v15, %v235_v20  ;;  %v278_v30 = vstv %s678_s3  ;;  %v250_v31 = vmax.f32 %v249_v23, 0.0  ;;  %v286_v34 = vstv %s683_s9 }
  0x52   :  { %v264_v32 = vadd.f32 %v263_v18, %v261_v24  ;;  %v276_v33 = vadd.f32 %v275_v26, %v272_v25  ;;  %v267_v36 = vstv %s686_s10  ;;  %v287_v37 = vmul.f32 %v286_v34, %v504_v0 }
  0x53   :  { %v239_v35 = vadd.f32 %v238_v28, %v224_v27  ;;  %v289_v38 = vstv %s688_s11  ;;  %v253_v39 = vmul.f32 %v252_v29, %v250_v31  ;;  %v282_v43 = vstv %s695_s12 }
  0x54   :  { %v265_v40 = vmax.f32 %v264_v32, 0.0  ;;  %v279_v41 = vadd.f32 %v278_v30, %v276_v33  ;;  %v290_v42 = vmul.f32 %v509_v1, %v289_v38  ;;  %v293_v44 = vstv %s697_s13 }
  0x55   :  { %v254_v45 = vadd.f32 %v253_v39, %v239_v35  ;;  %v306_v50 = vand.u32 127, %v303_v12  ;;  %v307_v51 = vmul.u32 2, %v663_v47  ;;  %v297_v0 = vstv %s403_s14 }
  0x56   :  { %v268_v46 = vmul.f32 %v267_v36, %v265_v40  ;;  %v280_v48 = vmax.f32 %v279_v41, 0.0  ;;  %v291_v49 = vadd.f32 %v290_v42, %v287_v37  ;;  %v301_v1 = vstv %s730_s4 }
  0x57   :  { %v308_v57 = vadd.s32 %v307_v51, %v306_v50 }
  0x58   :  { %v269_v52 = vadd.f32 %v268_v46, %v254_v45  ;;  %v283_v53 = vmul.f32 %v282_v43, %v280_v48  ;;  %v294_v54 = vadd.f32 %v293_v44, %v291_v49 }
  0x59   :  { %vm309_vm0 = vcmp.lt.s32.totalorder %v308_v57, 13 }
  0x5a   :  { %v284_v55 = vadd.f32 %v283_v53, %v269_v52  ;;  %v295_v56 = vmax.f32 %v294_v54, 0.0 }
  0x5c   :  { %v298_v58 = vmul.f32 %v297_v0, %v295_v56 }
  0x5e   :  { %v299_v59 = vadd.f32 %v298_v58, %v284_v55 }
  0x60   :  { %v302_v60 = vadd.f32 %v301_v1, %v299_v59 }
  0x62   :  { %v310_v61 = vsel %vm309_vm0, %v302_v60, -inf }
  0x63   :  { %v312_v12 = vsel %vm311_vm1, %v310_v61, -inf }
  0x64   :  { %313 = vmax.xlane.f32.xlu0 %v312_v12 }
  0xf1   :  { %v314_v47 = vpop.xlane.xlu0 %313 }
  0xf2   :  { %v315_v62 = vrot.slane %v314_v47, 4 }
  0xf4   :  { %v316_v63 = vmax.f32 %v314_v47, %v315_v62 }
  0xf6   :  { %v317_v2 = vrot.slane %v316_v63, 2 }
  0xf8   :  { %v318_v3 = vmax.f32 %v316_v63, %v317_v2 }
  0xfa   :  { %v319_v4 = vrot.slane %v318_v3, 1 }
  0xfc   :  { %v320_v5 = vmax.f32 %v318_v3, %v319_v4 }
  0xfe   :  { %v321_v6 = vsub.f32 %v310_v61, %v320_v5 }
 0x100   :  { %v322_v7 = vmul.f32 1.442695, %v321_v6 }
 0x102   :  { %407 = vpow2.f32 %v322_v7 }
 0x10c   :  { %v408_v8 = vpop.eup %407 }
 0x10d   :  { %v324_v9 = vsel %vm311_vm1, %v408_v8, 0.0 }
 0x10e   :  { %325 = vadd.xlane.f32.xlu0 %v324_v9 }
 0x19b   :  { %v326_v10 = vpop.xlane.xlu0 %325 }
 0x19c   :  { %v327_v11 = vrot.slane %v326_v10, 4 }
 0x19e   :  { %v328_v13 = vadd.f32 %v327_v11, %v326_v10 }
 0x1a0   :  { %v329_v14 = vrot.slane %v328_v13, 2 }
 0x1a2   :  { %v330_v15 = vadd.f32 %v329_v14, %v328_v13 }
 0x1a4   :  { %v331_v16 = vrot.slane %v330_v15, 1 }
 0x1a6   :  { %v332_v17 = vadd.f32 %v331_v16, %v330_v15 }
 0x1a8   :  { %409 = vrcp.f32 %v332_v17 }
 0x1b2   :  { %v410_v18 = vpop.eup %409 }
 0x1b3   :  { %v334_v19 = vmul.f32 %v410_v18, %v408_v8 }
 0x1b5   :  { %335 = vst.msk [vmem:[%s731_s5] sm:$0xff] %vm311_vm1, %v334_v19 }
 0x1b6   :  { %340 = vsyncpa [#allocation4], 1 }
 0x1b7   :  { %341 = vsyncpa [#allocation6], 1 }

</bundles_post_ra>
